<compile_context>
chip_gen: v6e
topology: v6e:2x2x1
jax: 0.10.0
libtpu: 0.0.40
codegen_flags: <defaults>
</compile_context>

<pallas_src>
import jax
import jax.numpy as jnp
from jax.experimental import pallas as pl
from jax.experimental.pallas import tpu as pltpu

_LANES = 128


def _h_sigmoid_kernel(x_ref, o_ref):
    x = x_ref[...]
    dt = x.dtype
    three = jnp.asarray(3.0, dt)
    zero = jnp.asarray(0.0, dt)
    six = jnp.asarray(6.0, dt)
    # relu6(x + 3) / 6  ==  clamp(x + 3, 0, 6) / 6   (true divide for torch parity)
    y = jnp.minimum(jnp.maximum(x + three, zero), six) / six
    o_ref[...] = y.astype(o_ref.dtype)


# ----------------------------- tiling helpers ------------------------------


def _round_up(n: int, m: int) -> int:
    return ((n + m - 1) // m) * m


def _device_kind() -> str:
    try:
        return jax.devices()[0].device_kind.lower()
    except Exception:
        return ""


def _num_tensorcores() -> int:
    # v7x exposes 2 TensorCores per chip (sharded via dimension_semantics
    # "parallel"); v5e / v6e have a single TensorCore.
    return 2 if "v7" in _device_kind() else 1


def _target_block_bytes() -> int:
    kind = _device_kind()
    if "v6" in kind or "v7" in kind:
        # 4 MiB blocks -> <=16 MiB with in+out double-buffering, safe under the
        # 32 MiB default scoped VMEM on v6e and v7x (64 MiB physical per TC).
        return 4 << 20
    # v5e (16 MiB default scoped VMEM) and unknown chips: 2 MiB blocks -> 8 MiB.
    return 2 << 20


def _dtype_packing(dtype) -> int:
    # Sublane packing multiple: 8 rows for 32-bit, 16 for 16-bit, 32 for 8-bit.
    return max(8, 32 // max(1, jnp.dtype(dtype).itemsize))


def _pick_tile_rows(rows: int, dtype) -> int:
    """Row-tile: constant block BYTES, packing-aligned, >=2 blocks/core on 2-TC chips."""
    pack = _dtype_packing(dtype)
    row_bytes = _LANES * jnp.dtype(dtype).itemsize
    target_rows = max(pack, (_target_block_bytes() // row_bytes) // pack * pack)
    n_cores = _num_tensorcores()

    if n_cores == 1 and rows <= target_rows:
        return rows  # single full-extent block; no pointless split on 1-TC chips
    if rows <= pack:
        return rows  # tiny: single full-extent block

    tr = min(target_rows, rows)
    if n_cores >= 2:
        min_blocks = 2 * n_cores  # >=2 grid steps per TensorCore keeps pipelines overlapped
        if rows >= min_blocks * pack and pl.cdiv(rows, tr) < min_blocks:
            tr = _round_up(pl.cdiv(rows, min_blocks), pack)
    return max(pack, (tr // pack) * pack)


# ------------------------------ pallas wrappers -----------------------------


def _h_sigmoid_slab(slab: jax.Array, tr: int, *, donate: bool) -> jax.Array:
    rows, lanes = slab.shape
    n = rows * lanes
    itemsize = jnp.dtype(slab.dtype).itemsize
    kwargs = {}
    if donate:
        # Reuse the input HBM buffer for the output (no HBM-traffic change, but
        # halves activation-memory pressure). Opt-in: requires a donated input.
        kwargs["input_output_aliases"] = {0: 0}
    return pl.pallas_call(
        _h_sigmoid_kernel,
        out_shape=jax.ShapeDtypeStruct((rows, lanes), slab.dtype),
        grid_spec=pltpu.PrefetchScalarGridSpec(
            num_scalar_prefetch=0,
            grid=(pl.cdiv(rows, tr),),
            in_specs=[pl.BlockSpec((tr, lanes), lambda i: (i, 0))],
            out_specs=pl.BlockSpec((tr, lanes), lambda i: (i, 0)),
        ),
        compiler_params=pltpu.CompilerParams(
            dimension_semantics=("parallel",),
        ),
        cost_estimate=pl.CostEstimate(
            flops=4 * n, transcendentals=0, bytes_accessed=2 * n * itemsize),
        **kwargs,
    )(slab)


def _h_sigmoid_flat(flat: jax.Array) -> jax.Array:
    """Ragged (size % 128 != 0) path: one kernel pass over the flat 1-D view."""
    total = flat.shape[0]
    itemsize = jnp.dtype(flat.dtype).itemsize
    cost = pl.CostEstimate(flops=4 * total, transcendentals=0,
                           bytes_accessed=2 * total * itemsize)
    if total * itemsize <= (512 << 10):
        # Single block == full array extent (always a legal block shape).
        return pl.pallas_call(
            _h_sigmoid_kernel,
            out_shape=jax.ShapeDtypeStruct(flat.shape, flat.dtype),
            cost_estimate=cost,
        )(flat)
    # Larger ragged inputs: 1-D blocks (multiple of 128); Pallas masks the
    # ragged final block. Conservative block bytes since a 1-D VMEM layout may
    # be sublane-padded.
    blk = max(_LANES, ((256 << 10) // itemsize) // _LANES * _LANES)
    return pl.pallas_call(
        _h_sigmoid_kernel,
        out_shape=jax.ShapeDtypeStruct(flat.shape, flat.dtype),
        grid_spec=pltpu.PrefetchScalarGridSpec(
            num_scalar_prefetch=0,
            grid=(pl.cdiv(total, blk),),
            in_specs=[pl.BlockSpec((blk,), lambda i: (i,))],
            out_specs=pl.BlockSpec((blk,), lambda i: (i,)),
        ),
        compiler_params=pltpu.CompilerParams(
            dimension_semantics=("parallel",),
        ),
        cost_estimate=cost,
    )(flat)


def h_sigmoid(x: jax.Array, *, donate: bool = False) -> jax.Array:
    """Elementwise hard-sigmoid matching torch ReLU6(x + 3) / 6 on any-shape input."""
    orig_shape = x.shape
    total = x.size
    if total == 0:
        return x

    if total % _LANES == 0:
        # Fast path: free reshape to a lane-dense 2-D slab; no padding, no slicing.
        rows = total // _LANES
        slab = jnp.reshape(x, (rows, _LANES))
        tr = _pick_tile_rows(rows, x.dtype)
        out_slab = _h_sigmoid_slab(slab, tr, donate=donate)
        return jnp.reshape(out_slab, orig_shape)

    # Ragged path: single kernel pass over the flat view (no pad / slice copies).
    flat = jnp.reshape(x, (total,))
    return jnp.reshape(_h_sigmoid_flat(flat), orig_shape)


def h_sigmoid_ref(x: jax.Array) -> jax.Array:
    return jnp.clip(x + 3.0, 0.0, 6.0) / 6.0


if __name__ == "__main__":
    key = jax.random.PRNGKey(0)

    # NCHW input, small shape (fast path, single/few-block grid).
    x = jax.random.normal(key, (2, 4, 16, 16), dtype=jnp.float32) * 4.0
    out = jax.block_until_ready(h_sigmoid(x))
    ref = h_sigmoid_ref(x)
    assert out.shape == x.shape and out.dtype == x.dtype
    assert jnp.allclose(out, ref, atol=1e-6, rtol=1e-6), "mismatch vs reference (f32 fast path)"

    # bf16 input (exercises dtype-scaled tiling / packing-multiple rounding).
    xb = (jax.random.normal(jax.random.PRNGKey(2), (2, 4, 16, 16), dtype=jnp.float32) * 4.0
          ).astype(jnp.bfloat16)
    outb = jax.block_until_ready(h_sigmoid(xb))
    refb = h_sigmoid_ref(xb)
    assert outb.shape == xb.shape and outb.dtype == xb.dtype
    assert jnp.allclose(outb.astype(jnp.float32), refb.astype(jnp.float32),
                        atol=2e-2, rtol=2e-2), "mismatch vs reference (bf16 fast path)"

    # Ragged shape (exercises the single-pass flat 1-D path, no pad/slice).
    x2 = jax.random.normal(jax.random.PRNGKey(1), (3, 5, 7, 9), dtype=jnp.float32) * 4.0
    out2 = jax.block_until_ready(h_sigmoid(x2))
    ref2 = h_sigmoid_ref(x2)
    assert out2.shape == x2.shape and out2.dtype == x2.dtype
    assert jnp.allclose(out2, ref2, atol=1e-6, rtol=1e-6), "mismatch vs reference (ragged path)"

    print("KERNEL_OK")
</pallas_src>

<mosaic_0001>
module attributes {stable_mosaic.version = 11 : i64} {
  func.func @_h_sigmoid_kernel(%arg0: i32, %arg1: memref<16x128xf32, #tpu.memory_space<vmem>>, %arg2: memref<16x128xf32, #tpu.memory_space<vmem>>) attributes {dimension_semantics = [#tpu.dimension_semantics<parallel>], iteration_bounds = array<i64: 1>, scalar_prefetch = 0 : i64, scratch_operands = 0 : i64, tpu.core_type = #tpu.core_type<tc>, window_params = [{transform_indices = @transform_0, window_bounds = array<i64: 16, 128>}, {transform_indices = @transform_1, window_bounds = array<i64: 16, 128>}]} {
    %c0 = arith.constant 0 : index
    %c0_0 = arith.constant 0 : index
    %0 = vector.load %arg1[%c0, %c0_0] : memref<16x128xf32, #tpu.memory_space<vmem>>, vector<16x128xf32>
    %cst = arith.constant 3.000000e+00 : f32
    %1 = vector.broadcast %cst : f32 to vector<16x128xf32>
    %2 = arith.addf %0, %1 : vector<16x128xf32>
    %cst_1 = arith.constant 0.000000e+00 : f32
    %3 = vector.broadcast %cst_1 : f32 to vector<16x128xf32>
    %4 = arith.maximumf %2, %3 : vector<16x128xf32>
    %cst_2 = arith.constant 6.000000e+00 : f32
    %5 = vector.broadcast %cst_2 : f32 to vector<16x128xf32>
    %6 = arith.minimumf %4, %5 : vector<16x128xf32>
    %cst_3 = arith.constant 6.000000e+00 : f32
    %7 = vector.broadcast %cst_3 : f32 to vector<16x128xf32>
    %8 = arith.divf %6, %7 : vector<16x128xf32>
    %c0_4 = arith.constant 0 : index
    %c0_5 = arith.constant 0 : index
    %9 = vector.load %arg2[%c0_4, %c0_5] : memref<16x128xf32, #tpu.memory_space<vmem>>, vector<16x128xf32>
    tpu.vector_store %arg2[%c0_4, %c0_5], %8 {strides = array<i32>} : memref<16x128xf32, #tpu.memory_space<vmem>>, vector<16x128xf32>,
    return
  }
  func.func @transform_0(%arg0: i32) -> (i32, i32) {
    %c0_i32 = arith.constant 0 : i32
    %c0_i32_0 = arith.constant 0 : i32
    return %arg0, %c0_i32 : i32, i32
  }
  func.func @transform_1(%arg0: i32) -> (i32, i32) {
    %c0_i32 = arith.constant 0 : i32
    %c0_i32_0 = arith.constant 0 : i32
    return %arg0, %c0_i32 : i32, i32
  }
}

</mosaic_0001>

<bundles_post_ra>
// kernel: tpu_custom_call.1
= control target key start
LH: loop header
LB: loop body
LE: loop exit
PB: predicated region body
PF: predicated region fallthrough
CT: control target
= control target key end

     0   :  { %6 = vsyncpa [#allocation3], 0  ;;  %s127_s0 = inlined_call_operand.hbm [shape: f32[16,128], index: 0, kind: input, shape index: {}]   ;;  %s128_s1 = inlined_call_operand.hbm [shape: f32[16,128], index: 1, kind: output, shape index: {}]  }
   0x1   :  { %7 = vsyncpa [#allocation4], 0  ;;  %s101_s6 = smov [#allocation2]  }
   0x2   :  { %s13_s7 = sshll.u32 %s101_s6, 4  ;;  %s14_s7 = int_to_ptr.vmem [resolvable:$true] %s13_s7 }
   0x3   :  { %s65_s8 = scalar_lea.vmem %s14_s7, 256  ;;  %p70_p1 = scmp.lt.s32.totalorder %s14_s7, %s14_s7 }
   0x4   :  { %p66_p0 = scmp.ne.s32.totalorder %s14_s7, %s65_s8  ;;  %p71_p2 = scmp.lt.s32.totalorder %s65_s8, %s65_s8 }
   0x6   :  { %p72_p3 = por %p71_p2, %p70_p1 }
   0x8   :  { %p73_p4 = pnand %p72_p3, %p66_p0 }
   0xa   :  { %76 = shalt.err (!%p73_p4)
}
   0xb   :  { %s102_s9 = smov 128   ;;  %s103_s10 = smov 8  }
   0xc   :  { %19 = dma.hbm_to_vmem [thread:$0]  %s127_s0, 256, %s14_s7, [#allocation3], %s102_s9, %s102_s9, %s103_s10  }
   0xd   :  { %97 = dma.done.wait [#allocation3], 256  }
   0xe   :  { %98 = vsyncadd [#allocation3], 4294967040  ;;  %v23_v0 = vld [vmem:[#allocation2] sm:$0xff]  ;;  %v24_v1 = vld [vmem:[#allocation2 + $0x8] sm:$0xff]  ;;  %s104_s13 = smov [#allocation5]  }
   0xf   :  { %v25_v2 = vadd.f32 3.0, %v23_v0  ;;  %v26_v3 = vadd.f32 3.0, %v24_v1  ;;  %s41_s14 = sshll.u32 %s104_s13, 4  ;;  %s42_s14 = int_to_ptr.vmem [resolvable:$true] %s41_s14 }
  0x10   :  { %s77_s15 = scalar_lea.vmem %s42_s14, 256  ;;  %p82_p6 = scmp.lt.s32.totalorder %s42_s14, %s42_s14 }
  0x11   :  { %v27_v4 = vmax.f32 %v25_v2, 0.0  ;;  %v28_v5 = vmax.f32 %v26_v3, 0.0  ;;  %p78_p5 = scmp.ne.s32.totalorder %s42_s14, %s77_s15  ;;  %p83_p7 = scmp.lt.s32.totalorder %s77_s15, %s77_s15 }
  0x13   :  { %v29_v6 = vmin.f32 %v27_v4, 6.0  ;;  %v30_v7 = vmin.f32 %v28_v5, 6.0  ;;  %p84_p8 = por %p83_p7, %p82_p6 }
  0x15   :  { %v32_v8 = vmul.f32 0.16666667, %v29_v6  ;;  %v33_v9 = vmul.f32 0.16666667, %v30_v7  ;;  %p85_p9 = pnand %p84_p8, %p78_p5 }
  0x17   :  { %34 = vst [vmem:[#allocation5] sm:$0xff] %v32_v8  ;;  %35 = vst [vmem:[#allocation5 + $0x8] sm:$0xff] %v33_v9 }
  0x18   :  { %88 = shalt.err (!%p85_p9)
}
  0x19   :  { %47 = dma.vmem_to_hbm [thread:$0]  %s42_s14, 256, %s128_s1, [#allocation4], %s102_s9, %s102_s9, %s103_s10  }
  0x1a   :  { %99 = dma.done.wait [#allocation4], 256  }
  0x1b   :  { %100 = vsyncadd [#allocation4], 4294967040 }
  0x1c   :  { %51 = vsyncpa [#allocation3], 1 }
  0x1d   :  { %52 = vsyncpa [#allocation4], 1 }

</bundles_post_ra>
